<compile_context>
chip_gen: v7x
topology: tpu7x:2x2x1
jax: 0.10.0
libtpu: 0.0.40
codegen_flags: <defaults>
</compile_context>

<pallas_src>
import jax
import jax.numpy as jnp
from jax.experimental import pallas as pl
from jax.experimental.pallas import tpu as pltpu


def qnetwork_kernel(x_ref, w1_ref, b1_ref, w2_ref, b2_ref, w3_ref, b3_ref,
                    out_ref):
    """Fused fc1 -> relu -> fc2 -> relu -> fc3 on one batch tile."""
    x = x_ref[...]  # f32 already; no redundant cast

    # fc1 + relu
    h1 = jnp.dot(x, w1_ref[...], preferred_element_type=jnp.float32)
    h1 = jnp.maximum(h1 + b1_ref[...], 0.0)

    # fc2 + relu
    h2 = jnp.dot(h1, w2_ref[...], preferred_element_type=jnp.float32)
    h2 = jnp.maximum(h2 + b2_ref[...], 0.0)

    # fc3 (no activation)
    out = jnp.dot(h2, w3_ref[...], preferred_element_type=jnp.float32)
    out_ref[...] = (out + b3_ref[...]).astype(out_ref.dtype)


def _cost_estimate(batch, s, h, a):
    flops = 2 * batch * (s * h + h * h + h * a)
    bytes_accessed = 4 * (batch * s              # x
                          + s * h + h            # fc1
                          + h * h + h            # fc2
                          + h * a + a            # fc3
                          + batch * a)           # out
    return pl.CostEstimate(flops=flops, transcendentals=0,
                           bytes_accessed=bytes_accessed)


def qnetwork_forward(x, params, *, batch_tile=256):
    """x: [B, state_size] f32.  params: w1 [S,H], b1 [1,H], w2 [H,H], b2 [1,H],
    w3 [H,A], b3 [1,A] (weights already transposed to in x out)."""
    w1, b1 = params["w1"], params["b1"]
    w2, b2 = params["w2"], params["b2"]
    w3, b3 = params["w3"], params["b3"]

    B = x.shape[0]
    S, H = w1.shape
    A = w3.shape[1]
    cost = _cost_estimate(B, S, H, A)

    if B <= batch_tile:
        # Toy / small batch: one ungridded call, everything resident in VMEM.
        vmem = pl.BlockSpec(memory_space=pltpu.MemorySpace.VMEM)
        return pl.pallas_call(
            qnetwork_kernel,
            out_shape=jax.ShapeDtypeStruct((B, A), jnp.float32),
            in_specs=[vmem] * 7,
            out_specs=vmem,
            cost_estimate=cost,
        )(x, w1, b1, w2, b2, w3, b3)

    # Large batch: stream batch tiles through a grid; weights stay resident.
    TB = batch_tile
    pad = (-B) % TB
    x_p = jnp.pad(x, ((0, pad), (0, 0))) if pad else x
    Bp = B + pad

    const = lambda i: (0, 0)  # weight/bias blocks never change -> fetched once
    out_p = pl.pallas_call(
        qnetwork_kernel,
        out_shape=jax.ShapeDtypeStruct((Bp, A), jnp.float32),
        grid=(Bp // TB,),
        in_specs=[
            pl.BlockSpec((TB, S), lambda i: (i, 0)),   # x: streamed per tile
            pl.BlockSpec((S, H), const),               # w1 resident
            pl.BlockSpec((1, H), const),               # b1
            pl.BlockSpec((H, H), const),               # w2
            pl.BlockSpec((1, H), const),               # b2
            pl.BlockSpec((H, A), const),               # w3
            pl.BlockSpec((1, A), const),               # b3
        ],
        out_specs=pl.BlockSpec((TB, A), lambda i: (i, 0)),
        compiler_params=pltpu.CompilerParams(
            dimension_semantics=("parallel",),      # megacore split on v7x
            vmem_limit_bytes=32 * 1024 * 1024,      # safe on v7x's 64 MiB VMEM
        ),
        cost_estimate=cost,
    )(x_p, w1, b1, w2, b2, w3, b3)
    return out_p[:B] if pad else out_p


def init_qnetwork_params(key, state_size, action_size, hidden_size=64):
    """nn.Linear-style U(-1/sqrt(fan_in), +1/sqrt(fan_in)) init.  Weights are
    stored transposed ([in, out]) vs PyTorch ([out, in]) so the kernel does
    x @ W directly — mathematically identical to torch's x @ W.T."""
    keys = jax.random.split(key, 6)

    def linear_init(kw, kb, fan_in, fan_out):
        bound = 1.0 / jnp.sqrt(jnp.float32(fan_in))
        w = jax.random.uniform(kw, (fan_in, fan_out), jnp.float32,
                               minval=-bound, maxval=bound)
        b = jax.random.uniform(kb, (1, fan_out), jnp.float32,
                               minval=-bound, maxval=bound)
        return w, b

    w1, b1 = linear_init(keys[0], keys[1], state_size, hidden_size)
    w2, b2 = linear_init(keys[2], keys[3], hidden_size, hidden_size)
    w3, b3 = linear_init(keys[4], keys[5], hidden_size, action_size)
    return {"w1": w1, "b1": b1, "w2": w2, "b2": b2, "w3": w3, "b3": b3}


def qnetwork_reference(x, params):
    """Pure-JAX reference for correctness checking."""
    h1 = jnp.maximum(x @ params["w1"] + params["b1"], 0.0)
    h2 = jnp.maximum(h1 @ params["w2"] + params["b2"], 0.0)
    return h2 @ params["w3"] + params["b3"]


if __name__ == "__main__":
    state_size, action_size, hidden_size = 8, 4, 64

    key = jax.random.PRNGKey(0)
    k_params, k_x_small, k_x_big = jax.random.split(key, 3)
    params = init_qnetwork_params(k_params, state_size, action_size,
                                  hidden_size)

    # --- small (toy) batch: ungridded fast path ---
    batch_small = 2
    x_small = jax.random.normal(k_x_small, (batch_small, state_size),
                                dtype=jnp.float32)
    out_small = jax.block_until_ready(qnetwork_forward(x_small, params))
    ref_small = qnetwork_reference(x_small, params)
    assert out_small.shape == (batch_small, action_size), out_small.shape
    assert jnp.allclose(out_small, ref_small, atol=1e-5, rtol=1e-5), (
        "Pallas kernel (small batch) mismatch vs reference")

    # --- large batch: batch-tiled grid path (weights resident, batch padded
    #     to the 256-row tile, "parallel" batch axis) ---
    batch_big = 600  # not a multiple of the tile -> exercises padding path
    x_big = jax.random.normal(k_x_big, (batch_big, state_size),
                              dtype=jnp.float32)
    out_big = jax.block_until_ready(qnetwork_forward(x_big, params,
                                                     batch_tile=256))
    ref_big = qnetwork_reference(x_big, params)
    assert out_big.shape == (batch_big, action_size), out_big.shape
    assert jnp.allclose(out_big, ref_big, atol=1e-4, rtol=1e-5), (
        "Pallas kernel (batched grid) mismatch vs reference")

    # TODO(synk): if the surrounding RL loop controls data layout, pack
    # state/action features lane-dense (multiples of 128) to avoid masked
    # partial stores; not done here to preserve the module's I/O contract.

    print("KERNEL_OK")
</pallas_src>

<mosaic_0001>
module attributes {stable_mosaic.version = 11 : i64} {
  func.func @qnetwork_kernel(%arg0: memref<2x8xf32, #tpu.memory_space<vmem>>, %arg1: memref<8x64xf32, #tpu.memory_space<vmem>>, %arg2: memref<1x64xf32, #tpu.memory_space<vmem>>, %arg3: memref<64x64xf32, #tpu.memory_space<vmem>>, %arg4: memref<1x64xf32, #tpu.memory_space<vmem>>, %arg5: memref<64x4xf32, #tpu.memory_space<vmem>>, %arg6: memref<1x4xf32, #tpu.memory_space<vmem>>, %arg7: memref<2x4xf32, #tpu.memory_space<vmem>>) attributes {dimension_semantics = [], scalar_prefetch = 0 : i64, scratch_operands = 0 : i64, tpu.core_type = #tpu.core_type<tc>} {
    %c0 = arith.constant 0 : index
    %c0_0 = arith.constant 0 : index
    %0 = vector.load %arg0[%c0, %c0_0] : memref<2x8xf32, #tpu.memory_space<vmem>>, vector<2x8xf32>
    %c0_1 = arith.constant 0 : index
    %c0_2 = arith.constant 0 : index
    %1 = vector.load %arg1[%c0_1, %c0_2] : memref<8x64xf32, #tpu.memory_space<vmem>>, vector<8x64xf32>
    %cst = arith.constant dense<0.000000e+00> : vector<2x64xf32>
    %2 = tpu.matmul %0, %1, %cst {dimension_numbers = #tpu.dot_dimension_numbers<[1], [0], [0], [1], [0, 0, 1, 1], [], []>} : vector<2x8xf32>, vector<8x64xf32>, vector<2x64xf32> -> vector<2x64xf32>
    %c0_3 = arith.constant 0 : index
    %c0_4 = arith.constant 0 : index
    %3 = vector.load %arg2[%c0_3, %c0_4] : memref<1x64xf32, #tpu.memory_space<vmem>>, vector<1x64xf32>
    %4 = vector.broadcast %3 : vector<1x64xf32> to vector<2x64xf32>
    %5 = arith.addf %2, %4 : vector<2x64xf32>
    %cst_5 = arith.constant 0.000000e+00 : f32
    %6 = vector.broadcast %cst_5 : f32 to vector<2x64xf32>
    %7 = arith.maximumf %5, %6 : vector<2x64xf32>
    %c0_6 = arith.constant 0 : index
    %c0_7 = arith.constant 0 : index
    %8 = vector.load %arg3[%c0_6, %c0_7] : memref<64x64xf32, #tpu.memory_space<vmem>>, vector<64x64xf32>
    %cst_8 = arith.constant dense<0.000000e+00> : vector<2x64xf32>
    %9 = tpu.matmul %7, %8, %cst_8 {dimension_numbers = #tpu.dot_dimension_numbers<[1], [0], [0], [1], [0, 0, 1, 1], [], []>} : vector<2x64xf32>, vector<64x64xf32>, vector<2x64xf32> -> vector<2x64xf32>
    %c0_9 = arith.constant 0 : index
    %c0_10 = arith.constant 0 : index
    %10 = vector.load %arg4[%c0_9, %c0_10] : memref<1x64xf32, #tpu.memory_space<vmem>>, vector<1x64xf32>
    %11 = vector.broadcast %10 : vector<1x64xf32> to vector<2x64xf32>
    %12 = arith.addf %9, %11 : vector<2x64xf32>
    %cst_11 = arith.constant 0.000000e+00 : f32
    %13 = vector.broadcast %cst_11 : f32 to vector<2x64xf32>
    %14 = arith.maximumf %12, %13 : vector<2x64xf32>
    %c0_12 = arith.constant 0 : index
    %c0_13 = arith.constant 0 : index
    %15 = vector.load %arg5[%c0_12, %c0_13] : memref<64x4xf32, #tpu.memory_space<vmem>>, vector<64x4xf32>
    %cst_14 = arith.constant dense<0.000000e+00> : vector<2x4xf32>
    %16 = tpu.matmul %14, %15, %cst_14 {dimension_numbers = #tpu.dot_dimension_numbers<[1], [0], [0], [1], [0, 0, 1, 1], [], []>} : vector<2x64xf32>, vector<64x4xf32>, vector<2x4xf32> -> vector<2x4xf32>
    %c0_15 = arith.constant 0 : index
    %c0_16 = arith.constant 0 : index
    %17 = vector.load %arg6[%c0_15, %c0_16] : memref<1x4xf32, #tpu.memory_space<vmem>>, vector<1x4xf32>
    %18 = vector.broadcast %17 : vector<1x4xf32> to vector<2x4xf32>
    %19 = arith.addf %16, %18 : vector<2x4xf32>
    %c0_17 = arith.constant 0 : index
    %c0_18 = arith.constant 0 : index
    %20 = vector.load %arg7[%c0_17, %c0_18] : memref<2x4xf32, #tpu.memory_space<vmem>>, vector<2x4xf32>
    tpu.vector_store %arg7[%c0_17, %c0_18], %19 {strides = array<i32>} : memref<2x4xf32, #tpu.memory_space<vmem>>, vector<2x4xf32>,
    return
  }
}

</mosaic_0001>

<bundles_post_ra>
// kernel: tpu_custom_call.1
= control target key start
LH: loop header
LB: loop body
LE: loop exit
PB: predicated region body
PF: predicated region fallthrough
CT: control target
= control target key end

     0   :  { %vm36_vm0 = vcmask 64512   ;;  %v426_v2 = vmov 0.0   ;;  %vm427_vm1 = vmmov 0   ;;  %v428_v6 = vmov 0.0|0.0   ;;  %s548_s0 = inlined_call_operand.vmem [shape: f32[2,8], index: 0, kind: input, shape index: {}]   ;;  %s549_s1 = inlined_call_operand.vmem [shape: f32[8,64], index: 1, kind: input, shape index: {}]   ;;  %s550_s2 = inlined_call_operand.vmem [shape: f32[1,64], index: 2, kind: input, shape index: {}]   ;;  %s551_s3 = inlined_call_operand.vmem [shape: f32[64,64], index: 3, kind: input, shape index: {}]   ;;  %s552_s4 = inlined_call_operand.vmem [shape: f32[1,64], index: 4, kind: input, shape index: {}]   ;;  %s553_s5 = inlined_call_operand.vmem [shape: f32[64,4], index: 5, kind: input, shape index: {}]   ;;  %s554_s6 = inlined_call_operand.vmem [shape: f32[1,4], index: 6, kind: input, shape index: {}]   ;;  %s555_s7 = inlined_call_operand.hbm [shape: f32[2,4], index: 7, kind: output, shape index: {}]  }
   0x1   :  { %v28_v0 = vld [vmem:[%s549_s1] sm:$0xff]  ;;  %331 = vmatprep.subr.mxu0 %v426_v2  ;;  %333 = vmatprep.mubr.msk.f32.mxu0 %vm427_vm1, %v426_v2  ;;  %v112_v4 = vld [vmem:[%s551_s3 + $0x8] sm:$0xff]  ;;  %v113_v5 = vld [vmem:[%s551_s3 + $0x10] sm:$0xff] }
   0x2   :  { %v27_v1 = vld [vmem:[%s548_s0] sm:$0x3]  ;;  %332 = vmatpush3.msra.mxu0 %v28_v0  ;;  %374 = vmatprep.subr.bf16.mxu1 %v428_v6  ;;  %v114_v8 = vld [vmem:[%s551_s3 + $0x18] sm:$0xff] }
   0x3   :  { %v111_v3 = vld [vmem:[%s551_s3] sm:$0xff]  ;;  %334 = vmatmul.mubr.msk.f32.vlgmr.msra.gmra.mrb[0].mxu0 %vm36_vm0, %v27_v1  ;;  %352 = vmatprep.mubr.msk.f32.mxu1 %vm427_vm1, %v426_v2 }
   0x4   :  { %v375_v7 = vpack.c.bf16 %v112_v4, %v111_v3 }
   0x5   :  { %12 = vsyncpa [#allocation3], 0  ;;  %v378_v9 = vpack.c.bf16 %v114_v8, %v113_v5  ;;  %386 = vmatprep.subr.bf16.mxu0 %v428_v6  ;;  %v115_v10 = vld [vmem:[%s551_s3 + $0x20] sm:$0xff]  ;;  %v116_v11 = vld [vmem:[%s551_s3 + $0x28] sm:$0xff]  ;;  %371 = vmatprep.mubr.msk.f32.mxu0 %vm427_vm1, %v426_v2  ;;  %vm126_vm2 = vcmask 523264   ;;  %s429_s14 = smov [#allocation2]  }
   0x6   :  { %376 = vmatpush3.bf16.msra.mxu1 %v375_v7  ;;  %v381_v12 = vpack.c.bf16 %v116_v11, %v115_v10  ;;  %v117_v13 = vld [vmem:[%s551_s3 + $0x30] sm:$0xff]  ;;  %v118_v14 = vld [vmem:[%s551_s3 + $0x38] sm:$0xff]  ;;  %v201_v16 = vld [vmem:[%s553_s5] sm:$0xff]  ;;  %s297_s15 = sshll.u32 %s429_s14, 4  ;;  %vm289_vm3 = vcmask 25600   ;;  %s298_s15 = int_to_ptr.vmem [resolvable:$true] %s297_s15 }
   0x7   :  { %377 = vmatprep.subr.bf16.mxu1 %v428_v6  ;;  %v384_v15 = vpack.c.bf16 %v118_v14, %v117_v13  ;;  %v202_v17 = vld [vmem:[%s553_s5 + $0x8] sm:$0xff]  ;;  %v203_v18 = vld [vmem:[%s553_s5 + $0x10] sm:$0xff]  ;;  %v204_v20 = vld [vmem:[%s553_s5 + $0x18] sm:$0xff]  ;;  %p407_p1 = scmp.lt.s32.totalorder %s298_s15, %s298_s15 }
   0x8   :  { %v387_v19 = vpack.c.bf16 %v202_v17, %v201_v16  ;;  %v390_v21 = vpack.c.bf16 %v204_v20, %v203_v18  ;;  %v205_v22 = vld [vmem:[%s553_s5 + $0x20] sm:$0xff]  ;;  %v206_v23 = vld [vmem:[%s553_s5 + $0x28] sm:$0xff]  ;;  %v207_v30 = vld [vmem:[%s553_s5 + $0x30] sm:$0xff] }
   0x9   :  { %v393_v24 = vpack.c.bf16 %v206_v23, %v205_v22  ;;  %v305_v25 = vld [vmem:[%s550_s2] ss:$0 sm:$0xff]  ;;  %v208_v31 = vld [vmem:[%s553_s5 + $0x38] sm:$0xff]  ;;  %s402_s5 = scalar_lea.vmem %s298_s15, 32 }
   0xa   :  { %379 = vmatpush3.bf16.msra.mxu1 %v378_v9  ;;  %388 = vmatpush3.bf16.msra.mxu0 %v387_v19  ;;  %v396_v32 = vpack.c.bf16 %v208_v31, %v207_v30  ;;  %v307_v33 = vld [vmem:[%s552_s4] ss:$0 sm:$0xff]  ;;  %p403_p0 = scmp.ne.s32.totalorder %s298_s15, %s402_s5  ;;  %p408_p2 = scmp.lt.s32.totalorder %s402_s5, %s402_s5 }
   0xb   :  { %380 = vmatprep.subr.bf16.mxu1 %v428_v6  ;;  %389 = vmatprep.subr.bf16.mxu0 %v428_v6  ;;  %v309_v38 = vld [vmem:[%s554_s6] ss:$0 sm:$0xff] }
   0xc   :  { %p409_p3 = por %p408_p2, %p407_p1 }
   0xe   :  { %382 = vmatpush3.bf16.msra.mxu1 %v381_v12  ;;  %391 = vmatpush3.bf16.msra.mxu0 %v390_v21  ;;  %p410_p4 = pnand %p409_p3, %p403_p0 }
   0xf   :  { %383 = vmatprep.subr.bf16.mxu1 %v428_v6  ;;  %392 = vmatprep.subr.bf16.mxu0 %v428_v6 }
  0x12   :  { %385 = vmatpush3.bf16.msra.mxu1 %v384_v15  ;;  %394 = vmatpush3.bf16.msra.mxu0 %v393_v24 }
  0x13   :  { %395 = vmatprep.subr.bf16.mxu0 %v428_v6 }
  0x16   :  { %397 = vmatpush3.bf16.msra.mxu0 %v396_v32 }
  0xd6   :  { %v106_v26 = vpop.f32.mrb[0].mxu0 }
  0xd7   :  { %v107_v27 = vadd.f32 %v305_v25, %v106_v26  ;;  %v335_v28 = vpop.f32.mrb[1].mxu0 }
  0xd9   :  { %v110_v29 = vmax.f32 %v107_v27, 0.0 }
  0xdb   :  { %353 = vmatmul.mubr.msk.f32.vlgmr.msra.gmra.mrb[0].mxu1 %vm126_vm2, %v110_v29 }
 0x1ae   :  { %v196_v34 = vpop.f32.mrb[0].mxu1 }
 0x1af   :  { %v197_v35 = vadd.f32 %v307_v33, %v196_v34  ;;  %v354_v36 = vpop.f32.mrb[1].mxu1 }
 0x1b1   :  { %v200_v37 = vmax.f32 %v197_v35, 0.0 }
 0x1b3   :  { %372 = vmatmul.mubr.msk.f32.vlgmr.msra.gmra.mrb[2].mxu0 %vm126_vm2, %v200_v37 }
 0x286   :  { %v285_v39 = vpop.f32.mrb[2].mxu0 }
 0x287   :  { %v286_v40 = vadd.f32 %v309_v38, %v285_v39  ;;  %v373_v41 = vpop.f32.mrb[3].mxu0 }
 0x289   :  { %290 = vst.msk [vmem:[#allocation2] sm:$0x3] %vm289_vm3, %v286_v40 }
 0x28a   :  { %413 = shalt.err (!%p410_p4)
}
 0x28b   :  { %s414_s17 = scalar_lea.hbm %s555_s7, 32 }
 0x28c   :  { %p415_p5 = scmp.ne.s32.totalorder %s555_s7, %s414_s17  ;;  %p418_p6 = scmp.lt.u32.totalorder %s414_s17, %s555_s7 }
 0x28e   :  { %p420_p7 = pnand %p418_p6, %p415_p5 }
 0x290   :  { %423 = shalt.err (!%p420_p7)
}
 0x291   :  { %300 = dma.vmem_to_hbm [thread:$0]  %s298_s15, 32, %s555_s7, [#allocation3]  }
 0x292   :  { %424 = dma.done.wait [#allocation3], 32  }
 0x293   :  { %425 = vsyncadd [#allocation3], 4294967264 }
 0x294   :  { %304 = vsyncpa [#allocation3], 1 }

</bundles_post_ra>
